<compile_context>
chip_gen: v5e
topology: v5e:2x2
jax: 0.10.0
libtpu: 0.0.40
codegen_flags: <defaults>
</compile_context>

<pallas_src>
import math
from functools import partial

import jax
import jax.numpy as jnp
from jax.experimental import pallas as pl
from jax.experimental.pallas import tpu as pltpu


def _attention_head_kernel(q_ref, k_ref, v_ref,
                           wq_ref, wk_ref, wv_ref,
                           bq_ref, bk_ref, bv_ref,
                           o_ref, *, head_dim):
    in_dtype = q_ref.dtype

    # Per-projection matmuls, (S, E) @ (E, H) -> (S, H), f32 accumulation,
    # bias added only where it is kept.
    q = jnp.dot(q_ref[0], wq_ref[...],
                preferred_element_type=jnp.float32) + bq_ref[...]
    k = jnp.dot(k_ref[0], wk_ref[...],
                preferred_element_type=jnp.float32) + bk_ref[...]
    v = jnp.dot(v_ref[0], wv_ref[...],
                preferred_element_type=jnp.float32) + bv_ref[...]

    # Scale q before QK^T (S*H multiplies instead of S*S).
    q = q * (1.0 / math.sqrt(head_dim))

    # scores[i, j] = sum_d q[i, d] * k[j, d] — contracting-last on both
    # operands, no explicit transpose materialized.
    scores = jax.lax.dot_general(
        q.astype(in_dtype), k.astype(in_dtype),
        dimension_numbers=(((1,), (1,)), ((), ())),
        preferred_element_type=jnp.float32)

    # TODO(synk): optional attention mask (masked_fill with -inf) not wired in;
    # the reference forward is exercised with mask=None.

    # Numerically-stable softmax over the key axis (f32 VPU/EUP math), with
    # the normalization deferred past the PV matmul: the reciprocal is
    # broadcast over H (S*H multiplies) instead of scaling the (S,S) weights.
    m = jnp.max(scores, axis=-1, keepdims=True)
    e = jnp.exp(scores - m)
    denom = jnp.sum(e, axis=-1, keepdims=True)

    out = jnp.dot(e.astype(in_dtype), v.astype(in_dtype),
                  preferred_element_type=jnp.float32)
    out = out * pl.reciprocal(denom, approx=False)

    # TODO(synk): H=16 < 128 lanes means this is a masked store; for
    # production (multi-head / long-seq) shapes present a lane-dense output
    # slab (stacked heads, last dim a multiple of 128) and switch to a
    # flash-style (batch, q-tile, kv-tile) grid with online-softmax scratch.
    o_ref[0] = out.astype(o_ref.dtype)


@jax.jit
def attention_head(query, key, value, wq, bq, wk, bk, wv, bv):
    """query/key/value: [B, S, E]; w*: [E, H]; b*: [H].  Returns [B, S, H]."""
    B, S, E = query.shape
    H = wq.shape[1]

    # Biases as (1, H) rows so they broadcast onto the (S, H) projections.
    bq2 = bq.reshape(1, H)
    bk2 = bk.reshape(1, H)
    bv2 = bv.reshape(1, H)

    kernel = partial(_attention_head_kernel, head_dim=H)

    act_spec = pl.BlockSpec((1, S, E), lambda b: (b, 0, 0))
    w_spec = pl.BlockSpec((E, H), lambda b: (0, 0))
    b_spec = pl.BlockSpec((1, H), lambda b: (0, 0))

    return pl.pallas_call(
        kernel,
        out_shape=jax.ShapeDtypeStruct((B, S, H), query.dtype),
        grid_spec=pltpu.PrefetchScalarGridSpec(
            num_scalar_prefetch=0,
            grid=(B,),
            in_specs=[act_spec, act_spec, act_spec,
                      w_spec, w_spec, w_spec,
                      b_spec, b_spec, b_spec],
            out_specs=pl.BlockSpec((1, S, H), lambda b: (b, 0, 0)),
        ),
        compiler_params=pltpu.CompilerParams(
            dimension_semantics=("parallel",)),
    )(query, key, value, wq, wk, wv, bq2, bk2, bv2)


def _reference(query, key, value, wq, bq, wk, bk, wv, bv):
    q = query @ wq + bq
    k = key @ wk + bk
    v = value @ wv + bv
    scores = jnp.einsum("bqd,bkd->bqk", q, k) / math.sqrt(q.shape[-1])
    w = jax.nn.softmax(scores, axis=-1)
    return jnp.einsum("bqk,bkd->bqd", w, v)


if __name__ == "__main__":
    # Small shapes consistent with the module's forward:
    #   batch=2, seq=8, embed_dim=32, head_dim=16
    B, S, E, H = 2, 8, 32, 16
    key0 = jax.random.PRNGKey(0)
    ks = jax.random.split(key0, 9)

    query = jax.random.normal(ks[0], (B, S, E), dtype=jnp.float32)
    key_in = jax.random.normal(ks[1], (B, S, E), dtype=jnp.float32)
    value = jax.random.normal(ks[2], (B, S, E), dtype=jnp.float32)

    # Deterministic nn.Linear-style init (uniform in +/- 1/sqrt(fan_in)).
    bound = 1.0 / math.sqrt(E)
    wq = jax.random.uniform(ks[3], (E, H), minval=-bound, maxval=bound, dtype=jnp.float32)
    wk = jax.random.uniform(ks[4], (E, H), minval=-bound, maxval=bound, dtype=jnp.float32)
    wv = jax.random.uniform(ks[5], (E, H), minval=-bound, maxval=bound, dtype=jnp.float32)
    bq = jax.random.uniform(ks[6], (H,), minval=-bound, maxval=bound, dtype=jnp.float32)
    bk = jax.random.uniform(ks[7], (H,), minval=-bound, maxval=bound, dtype=jnp.float32)
    bv = jax.random.uniform(ks[8], (H,), minval=-bound, maxval=bound, dtype=jnp.float32)

    out = attention_head(query, key_in, value, wq, bq, wk, bk, wv, bv)
    out = jax.block_until_ready(out)

    ref = _reference(query, key_in, value, wq, bq, wk, bk, wv, bv)
    assert out.shape == (B, S, H)
    assert jnp.allclose(out, ref, atol=1e-4, rtol=1e-4), "mismatch vs reference"

    print("KERNEL_OK")
</pallas_src>

<mosaic_0001>
module attributes {stable_mosaic.version = 11 : i64} {
  func.func @_attention_head_kernel(%arg0: i32, %arg1: memref<1x8x32xf32, #tpu.memory_space<vmem>>, %arg2: memref<1x8x32xf32, #tpu.memory_space<vmem>>, %arg3: memref<1x8x32xf32, #tpu.memory_space<vmem>>, %arg4: memref<32x16xf32, #tpu.memory_space<vmem>>, %arg5: memref<32x16xf32, #tpu.memory_space<vmem>>, %arg6: memref<32x16xf32, #tpu.memory_space<vmem>>, %arg7: memref<1x16xf32, #tpu.memory_space<vmem>>, %arg8: memref<1x16xf32, #tpu.memory_space<vmem>>, %arg9: memref<1x16xf32, #tpu.memory_space<vmem>>, %arg10: memref<1x8x16xf32, #tpu.memory_space<vmem>>) attributes {dimension_semantics = [#tpu.dimension_semantics<parallel>], iteration_bounds = array<i64: 2>, scalar_prefetch = 0 : i64, scratch_operands = 0 : i64, tpu.core_type = #tpu.core_type<tc>, window_params = [{transform_indices = @transform_0, window_bounds = array<i64: 1, 8, 32>}, {transform_indices = @transform_1, window_bounds = array<i64: 1, 8, 32>}, {transform_indices = @transform_2, window_bounds = array<i64: 1, 8, 32>}, {pipeline_mode = #tpu.pipeline_mode<synchronous>, transform_indices = @transform_3, window_bounds = array<i64: 32, 16>}, {pipeline_mode = #tpu.pipeline_mode<synchronous>, transform_indices = @transform_4, window_bounds = array<i64: 32, 16>}, {pipeline_mode = #tpu.pipeline_mode<synchronous>, transform_indices = @transform_5, window_bounds = array<i64: 32, 16>}, {pipeline_mode = #tpu.pipeline_mode<synchronous>, transform_indices = @transform_6, window_bounds = array<i64: 1, 16>}, {pipeline_mode = #tpu.pipeline_mode<synchronous>, transform_indices = @transform_7, window_bounds = array<i64: 1, 16>}, {pipeline_mode = #tpu.pipeline_mode<synchronous>, transform_indices = @transform_8, window_bounds = array<i64: 1, 16>}, {transform_indices = @transform_9, window_bounds = array<i64: 1, 8, 16>}]} {
    %c0 = arith.constant 0 : index
    %c0_0 = arith.constant 0 : index
    %c0_1 = arith.constant 0 : index
    %0 = vector.load %arg1[%c0, %c0_0, %c0_1] : memref<1x8x32xf32, #tpu.memory_space<vmem>>, vector<1x8x32xf32>
    %1 = vector.shape_cast %0 : vector<1x8x32xf32> to vector<8x32xf32>
    %c0_2 = arith.constant 0 : index
    %c0_3 = arith.constant 0 : index
    %2 = vector.load %arg4[%c0_2, %c0_3] : memref<32x16xf32, #tpu.memory_space<vmem>>, vector<32x16xf32>
    %cst = arith.constant dense<0.000000e+00> : vector<8x16xf32>
    %3 = tpu.matmul %1, %2, %cst {dimension_numbers = #tpu.dot_dimension_numbers<[1], [0], [0], [1], [0, 0, 1, 1], [], []>} : vector<8x32xf32>, vector<32x16xf32>, vector<8x16xf32> -> vector<8x16xf32>
    %c0_4 = arith.constant 0 : index
    %c0_5 = arith.constant 0 : index
    %4 = vector.load %arg7[%c0_4, %c0_5] : memref<1x16xf32, #tpu.memory_space<vmem>>, vector<1x16xf32>
    %5 = vector.broadcast %4 : vector<1x16xf32> to vector<8x16xf32>
    %6 = arith.addf %3, %5 : vector<8x16xf32>
    %c0_6 = arith.constant 0 : index
    %c0_7 = arith.constant 0 : index
    %c0_8 = arith.constant 0 : index
    %7 = vector.load %arg2[%c0_6, %c0_7, %c0_8] : memref<1x8x32xf32, #tpu.memory_space<vmem>>, vector<1x8x32xf32>
    %8 = vector.shape_cast %7 : vector<1x8x32xf32> to vector<8x32xf32>
    %c0_9 = arith.constant 0 : index
    %c0_10 = arith.constant 0 : index
    %9 = vector.load %arg5[%c0_9, %c0_10] : memref<32x16xf32, #tpu.memory_space<vmem>>, vector<32x16xf32>
    %cst_11 = arith.constant dense<0.000000e+00> : vector<8x16xf32>
    %10 = tpu.matmul %8, %9, %cst_11 {dimension_numbers = #tpu.dot_dimension_numbers<[1], [0], [0], [1], [0, 0, 1, 1], [], []>} : vector<8x32xf32>, vector<32x16xf32>, vector<8x16xf32> -> vector<8x16xf32>
    %c0_12 = arith.constant 0 : index
    %c0_13 = arith.constant 0 : index
    %11 = vector.load %arg8[%c0_12, %c0_13] : memref<1x16xf32, #tpu.memory_space<vmem>>, vector<1x16xf32>
    %12 = vector.broadcast %11 : vector<1x16xf32> to vector<8x16xf32>
    %13 = arith.addf %10, %12 : vector<8x16xf32>
    %c0_14 = arith.constant 0 : index
    %c0_15 = arith.constant 0 : index
    %c0_16 = arith.constant 0 : index
    %14 = vector.load %arg3[%c0_14, %c0_15, %c0_16] : memref<1x8x32xf32, #tpu.memory_space<vmem>>, vector<1x8x32xf32>
    %15 = vector.shape_cast %14 : vector<1x8x32xf32> to vector<8x32xf32>
    %c0_17 = arith.constant 0 : index
    %c0_18 = arith.constant 0 : index
    %16 = vector.load %arg6[%c0_17, %c0_18] : memref<32x16xf32, #tpu.memory_space<vmem>>, vector<32x16xf32>
    %cst_19 = arith.constant dense<0.000000e+00> : vector<8x16xf32>
    %17 = tpu.matmul %15, %16, %cst_19 {dimension_numbers = #tpu.dot_dimension_numbers<[1], [0], [0], [1], [0, 0, 1, 1], [], []>} : vector<8x32xf32>, vector<32x16xf32>, vector<8x16xf32> -> vector<8x16xf32>
    %c0_20 = arith.constant 0 : index
    %c0_21 = arith.constant 0 : index
    %18 = vector.load %arg9[%c0_20, %c0_21] : memref<1x16xf32, #tpu.memory_space<vmem>>, vector<1x16xf32>
    %19 = vector.broadcast %18 : vector<1x16xf32> to vector<8x16xf32>
    %20 = arith.addf %17, %19 : vector<8x16xf32>
    %cst_22 = arith.constant 2.500000e-01 : f32
    %21 = vector.broadcast %cst_22 : f32 to vector<8x16xf32>
    %22 = arith.mulf %6, %21 : vector<8x16xf32>
    %cst_23 = arith.constant dense<0.000000e+00> : vector<8x8xf32>
    %23 = tpu.matmul %22, %13, %cst_23 {dimension_numbers = #tpu.dot_dimension_numbers<[1], [1], [0], [0], [0, 0, 1, 0], [], []>} : vector<8x16xf32>, vector<8x16xf32>, vector<8x8xf32> -> vector<8x8xf32>
    %cst_24 = arith.constant dense<0xFF800000> : vector<8xf32>
    %24 = vector.multi_reduction <maximumf>, %23, %cst_24 [1] : vector<8x8xf32> to vector<8xf32>
    %25 = vector.shape_cast %24 : vector<8xf32> to vector<8x1xf32>
    %26 = vector.broadcast %25 : vector<8x1xf32> to vector<8x8xf32>
    %27 = arith.subf %23, %26 : vector<8x8xf32>
    %28 = math.exp %27 : vector<8x8xf32>
    %cst_25 = arith.constant dense<0.000000e+00> : vector<8xf32>
    %29 = vector.multi_reduction <add>, %28, %cst_25 [1] : vector<8x8xf32> to vector<8xf32>
    %30 = vector.shape_cast %29 : vector<8xf32> to vector<8x1xf32>
    %cst_26 = arith.constant dense<0.000000e+00> : vector<8x16xf32>
    %31 = tpu.matmul %28, %20, %cst_26 {dimension_numbers = #tpu.dot_dimension_numbers<[1], [0], [0], [1], [0, 0, 1, 1], [], []>} : vector<8x8xf32>, vector<8x16xf32>, vector<8x16xf32> -> vector<8x16xf32>
    %32 = tpu.reciprocal %30 : vector<8x1xf32> -> vector<8x1xf32>
    %33 = vector.broadcast %32 : vector<8x1xf32> to vector<8x16xf32>
    %34 = arith.mulf %31, %33 : vector<8x16xf32>
    %c0_27 = arith.constant 0 : index
    %c0_28 = arith.constant 0 : index
    %c0_29 = arith.constant 0 : index
    %35 = vector.load %arg10[%c0_27, %c0_28, %c0_29] : memref<1x8x16xf32, #tpu.memory_space<vmem>>, vector<1x8x16xf32>
    %36 = vector.shape_cast %35 : vector<1x8x16xf32> to vector<8x16xf32>
    %37 = vector.shape_cast %34 : vector<8x16xf32> to vector<1x8x16xf32>
    tpu.vector_store %arg10[%c0_27, %c0_28, %c0_29], %37 {strides = array<i32>} : memref<1x8x16xf32, #tpu.memory_space<vmem>>, vector<1x8x16xf32>,
    return
  }
  func.func @transform_0(%arg0: i32) -> (i32, i32, i32) {
    %c0_i32 = arith.constant 0 : i32
    %c0_i32_0 = arith.constant 0 : i32
    %c0_i32_1 = arith.constant 0 : i32
    return %arg0, %c0_i32, %c0_i32_0 : i32, i32, i32
  }
  func.func @transform_1(%arg0: i32) -> (i32, i32, i32) {
    %c0_i32 = arith.constant 0 : i32
    %c0_i32_0 = arith.constant 0 : i32
    %c0_i32_1 = arith.constant 0 : i32
    return %arg0, %c0_i32, %c0_i32_0 : i32, i32, i32
  }
  func.func @transform_2(%arg0: i32) -> (i32, i32, i32) {
    %c0_i32 = arith.constant 0 : i32
    %c0_i32_0 = arith.constant 0 : i32
    %c0_i32_1 = arith.constant 0 : i32
    return %arg0, %c0_i32, %c0_i32_0 : i32, i32, i32
  }
  func.func @transform_3(%arg0: i32) -> (i32, i32) {
    %c0_i32 = arith.constant 0 : i32
    %c0_i32_0 = arith.constant 0 : i32
    %c0_i32_1 = arith.constant 0 : i32
    return %c0_i32, %c0_i32_0 : i32, i32
  }
  func.func @transform_4(%arg0: i32) -> (i32, i32) {
    %c0_i32 = arith.constant 0 : i32
    %c0_i32_0 = arith.constant 0 : i32
    %c0_i32_1 = arith.constant 0 : i32
    return %c0_i32, %c0_i32_0 : i32, i32
  }
  func.func @transform_5(%arg0: i32) -> (i32, i32) {
    %c0_i32 = arith.constant 0 : i32
    %c0_i32_0 = arith.constant 0 : i32
    %c0_i32_1 = arith.constant 0 : i32
    return %c0_i32, %c0_i32_0 : i32, i32
  }
  func.func @transform_6(%arg0: i32) -> (i32, i32) {
    %c0_i32 = arith.constant 0 : i32
    %c0_i32_0 = arith.constant 0 : i32
    %c0_i32_1 = arith.constant 0 : i32
    return %c0_i32, %c0_i32_0 : i32, i32
  }
  func.func @transform_7(%arg0: i32) -> (i32, i32) {
    %c0_i32 = arith.constant 0 : i32
    %c0_i32_0 = arith.constant 0 : i32
    %c0_i32_1 = arith.constant 0 : i32
    return %c0_i32, %c0_i32_0 : i32, i32
  }
  func.func @transform_8(%arg0: i32) -> (i32, i32) {
    %c0_i32 = arith.constant 0 : i32
    %c0_i32_0 = arith.constant 0 : i32
    %c0_i32_1 = arith.constant 0 : i32
    return %c0_i32, %c0_i32_0 : i32, i32
  }
  func.func @transform_9(%arg0: i32) -> (i32, i32, i32) {
    %c0_i32 = arith.constant 0 : i32
    %c0_i32_0 = arith.constant 0 : i32
    %c0_i32_1 = arith.constant 0 : i32
    return %arg0, %c0_i32, %c0_i32_0 : i32, i32, i32
  }
}

</mosaic_0001>

<bundles_post_ra>
// kernel: attention_head.1
= control target key start
LH: loop header
LB: loop body
LE: loop exit
PB: predicated region body
PF: predicated region fallthrough
CT: control target
= control target key end

     0   :  { %14 = vsyncpa [#allocation3], 0  ;;  %s955_s0 = inlined_call_operand.vmem [shape: f32[2,8,32], index: 0, kind: input, shape index: {}]   ;;  %s956_s1 = inlined_call_operand.vmem [shape: f32[2,8,32], index: 1, kind: input, shape index: {}]   ;;  %s957_s2 = inlined_call_operand.vmem [shape: f32[2,8,32], index: 2, kind: input, shape index: {}]   ;;  %s958_s3 = inlined_call_operand.vmem [shape: f32[32,16], index: 3, kind: input, shape index: {}]   ;;  %s959_s4 = inlined_call_operand.vmem [shape: f32[32,16], index: 4, kind: input, shape index: {}]   ;;  %s960_s5 = inlined_call_operand.vmem [shape: f32[32,16], index: 5, kind: input, shape index: {}]   ;;  %s961_s6 = inlined_call_operand.vmem [shape: f32[1,16], index: 6, kind: input, shape index: {}]   ;;  %s962_s7 = inlined_call_operand.vmem [shape: f32[1,16], index: 7, kind: input, shape index: {}]   ;;  %s963_s8 = inlined_call_operand.vmem [shape: f32[1,16], index: 8, kind: input, shape index: {}]   ;;  %s964_s9 = inlined_call_operand.hbm [shape: f32[2,8,16], index: 9, kind: output, shape index: {}]  }
   0x1   :  { %16 = vsyncpa [#allocation3 + $0x1], 0  ;;  %s813_s30 = smov 0   ;;  %s815_s10 = smov 0  }
   0x2   :  { %s817_s11 = smov 0   ;;  %s819_s12 = smov 0  }
   0x3 LB: > { %s834_s13 = sadd.s32 4294967295, %s761_s12   ;;  %s635_s14 = sadd.s32 4294967294, %s761_s12   ;;  %s761_s12 = sphi %s819_s12, %s970_s12   ;;  %s757_s11 = sphi %s817_s11, %s969_s11   ;;  %s753_s10 = sphi %s815_s10, %s968_s10   ;;  %s749_s30 = sphi %s813_s30, %s967_s30  }
   0x4   : > { %s838_s15 = sadd.s32 1, %s761_s12   ;;  %s233_s16 = sadd.s32 1, %s757_s11 }
   0x5   : > { %s230_s17 = ssub.s32 %s761_s12, %s838_s15  ;;  %p243_p0 = scmp.ne.s32.totalorder %s757_s11, %s753_s10 }
   0x6   : > { %p231_p1 = scmp.eq.s32.totalorder %s230_s17, 0  ;;  %p244_p2 = scmp.eq.s32.totalorder %s834_s13, 1 }
   0x7   : > { %p249_p3 = scmp.ne.s32.totalorder %s753_s10, %s749_s30  ;;  %p250_p4 = scmp.eq.s32.totalorder %s635_s14, 1 }
   0x8   : > { %s849_s18 = scalar_select %p231_p1, %s757_s11, %s233_s16  }
   0x9   : > { %p851_p5 = por %p244_p2, %p243_p0  ;;  %p855_p6 = por %p250_p4, %p249_p3 }
   0xa   : > { %p638_p7 = scmp.ge.s32.totalorder %s761_s12, 1  ;;  %p307_p8 = scmp.lt.s32.totalorder %s761_s12, 3 }
   0xc   : > { %p308_p9 = pnand %p638_p7, %p307_p8 }
   0xd   : > { %p350_p10 = scmp.lt.s32.totalorder (!%p308_p9), %s834_s13, 1  ;;  %s347_s27 = sand.u32 (!%p308_p9), 1, %s753_s10  }
   0xe   : > { %311 = sbr.rel (%p308_p9) target bundleno = 557 (0x22d), region = 56  ;;  %s639_s28 = sshll.u32 (!%p308_p9), %s347_s27, 3 }
  0x13   : > { %v399_v0 = vld [vmem:[%s959_s4 + $0x18] sm:$0xff]  ;;  %v398_v2 = vld [vmem:[%s959_s4 + $0x10] sm:$0xff]  ;;  %v397_v4 = vld [vmem:[%s959_s4 + $0x8] sm:$0xff]  ;;  %s351_s21 = scalar_select %p350_p10, %s834_s13, 1  ;;  %vm371_vm0 = vcmask 261120   ;;  %vm460_vm1 = vcmask 130048  }
  0x14   : > { %v366_v1 = vld [vmem:[%s958_s3 + $0x18] sm:$0xff]  ;;  %419 = vmatpush.msra.mxu1 %v399_v0  ;;  %v365_v3 = vld [vmem:[%s958_s3 + $0x10] sm:$0xff]  ;;  %v364_v5 = vld [vmem:[%s958_s3 + $0x8] sm:$0xff]  ;;  %vm487_vm2 = vcmask 64512  }
  0x15   : > { %387 = vmatpush.msra.mxu0 %v366_v1  ;;  %v396_v6 = vld [vmem:[%s959_s4] sm:$0xff]  ;;  %s640_s26 = sshll.u32 %s351_s21, 3  ;;  %v431_v10 = vld [vmem:[%s960_s5 + $0x18] sm:$0xff]  ;;  %v430_v11 = vld [vmem:[%s960_s5 + $0x10] sm:$0xff]  ;;  %s349_s21 = scalar_lea.vmem [#allocation2], %s639_s28 }
  0x16   : > { %420 = vmatpush.msra.mxu1 %v398_v2  ;;  %v363_v7 = vld [vmem:[%s958_s3] sm:$0xff]  ;;  %s357_s29 = scalar_lea.vmem %s956_s1, %s640_s26  ;;  %s353_s17 = scalar_lea.vmem %s955_s0, %s640_s26  ;;  %451 = vmatpush.msra.mxu2 %v431_v10  ;;  %v429_v12 = vld [vmem:[%s960_s5 + $0x8] sm:$0xff] }
  0x17   : > { %388 = vmatpush.msra.mxu0 %v365_v3  ;;  %v395_v8 = vld [vmem:[%s357_s29] sm:$0xff]  ;;  %s361_s14 = scalar_lea.vmem %s957_s2, %s640_s26  ;;  %s650_s29 = sshll.u32 %s834_s13, 3 }
  0x18   : > { %421 = vmatpush.msra.mxu1 %v397_v4  ;;  %v362_v9 = vld [vmem:[%s353_s17] sm:$0xff]  ;;  %452 = vmatpush.msra.mxu2 %v430_v11  ;;  %s547_s17 = scalar_lea.hbm %s964_s9, %s650_s29  ;;  %s549_s22 = sshll.u32 %s349_s21, 4  ;;  %s550_s22 = int_to_ptr.vmem [resolvable:$true] %s549_s22 }
  0x19   : > { %389 = vmatpush.msra.mxu0 %v364_v5  ;;  %v428_v13 = vld [vmem:[%s960_s5] sm:$0xff]  ;;  %s551_s23 = sshll.u32 %s547_s17, 4  ;;  %s537_s13 = scalar_lea.sflag [#allocation3], %s347_s27  ;;  %s552_s23 = int_to_ptr.hbm [resolvable:$true] %s551_s23 }
  0x1a   : > { %422 = vmatpush.msra.mxu1 %v396_v6  ;;  %453 = vmatpush.msra.mxu2 %v429_v12  ;;  %v427_v14 = vld [vmem:[%s361_s14] sm:$0xff]  ;;  %s713_s24 = sshra.s32 %s552_s23, 4  ;;  %s719_s29 = scalar_lea.hbm %s964_s9, 16  ;;  %s714_s24 = int_to_ptr.hbm [resolvable:$true] %s713_s24 }
  0x1b   : > { %390 = vmatpush.msra.mxu0 %v363_v7  ;;  %644 = vmatmul.msk.f32.vlgmr.msra.gmra.mxu1 %vm371_vm0, %v395_v8  ;;  %v692_v15 = vld [vmem:[%s962_s7] ss:$0 sm:$0xff]  ;;  %s715_s26 = scalar_lea.hbm %s714_s24, 8  ;;  %p720_p0 = scmp.lt.s32.totalorder %s714_s24, %s964_s9 }
  0x1c   : > { %643 = vmatmul.msk.f32.vlgmr.msra.gmra.mxu0 %vm371_vm0, %v362_v9  ;;  %454 = vmatpush.msra.mxu2 %v428_v13  ;;  %v693_v16 = vld [vmem:[%s961_s6] ss:$0 sm:$0xff]  ;;  %p716_p11 = scmp.ne.s32.totalorder %s714_s24, %s715_s26  ;;  %p721_p1 = scmp.lt.s32.totalorder %s719_s29, %s715_s26 }
  0x1d   : > { %645 = vmatmul.msk.f32.vlgmr.msra.gmra.mxu2 %vm371_vm0, %v427_v14  ;;  %v694_v24 = vld [vmem:[%s963_s8] ss:$0 sm:$0xff] }
  0x1e   : > { %p717_p12 = pnand %p716_p11, %p851_p5  ;;  %p722_p2 = por %p721_p1, %p720_p0 }
  0x20   : > { %p718_p13 = pneg %p717_p12 }
  0x22   : > { %p723_p3 = pnand %p722_p2, %p718_p13 }
  0x98   : > { %v424_v17 = vpop.f32.mrf.mxu1 }
  0x99   : > { %v392_v18 = vpop.f32.mrf.mxu0  ;;  %v425_v19 = vadd.f32 %v692_v15, %v424_v17 }
  0x9a   : > { %v393_v20 = vadd.f32 %v693_v16, %v392_v18 }
  0x9b   : > { %646 = vmatpush.xpose.msk.msra.mxu3 %vm460_vm1, %v425_v19 }
  0x9c   : > { %v459_v21 = vmul.f32 0.25, %v393_v20 }
  0x9e   : > { %647 = vmatmul.msk.f32.vlgmr.msra.gmra.mxu3 %vm460_vm1, %v459_v21 }
  0xa0   : > { %v456_v25 = vpop.f32.mrf.mxu2 }
  0xa1   : > { %v457_v26 = vadd.f32 %v694_v24, %v456_v25 }
  0xa3   : > { %515 = vmatpush.msrb.mxu3 %v457_v26 }
 0x121   : > { %v484_v22 = vpop.f32.mrf.mxu3 }
 0x122   : > { %v488_v23 = vsel %vm487_vm2, %v484_v22, -inf }
 0x123   : > { %489 = vmax.xlane.f32.xlu0 %v488_v23 }
 0x196   : > { %v490_v27 = vpop.xlane.xlu0 %489 }
 0x197   : > { %v491_v28 = vsub.f32 %v484_v22, %v490_v27 }
 0x199   : > { %v492_v29 = vmul.f32 1.442695, %v491_v28 }
 0x19b   : > { %695 = vpow2.f32 %v492_v29 }
 0x1a1   : > { %v696_v30 = vpop.eup %695 }
 0x1a2   : > { %648 = vmatmul.msk.f32.vlgmr.msrb.gmra.mxu3 %vm487_vm2, %v696_v30  ;;  %v494_v31 = vsel %vm487_vm2, %v696_v30, 0.0 }
 0x1a3   : > { %495 = vadd.xlane.f32.xlu0 %v494_v31 }
 0x216   : > { %v496_v32 = vpop.xlane.xlu0 %495 }
 0x217   : > { %697 = vrcp.f32 %v496_v32  ;;  %v531_v36 = vand.u32 2147483648, %v496_v32  ;;  %v529_v38 = vand.u32 2147483647, %v496_v32  ;;  %vm525_vm4 = vweird.f32 %v496_v32 }
 0x219   : > { %v532_v40 = vor.u32 1.1754944e-38, %v531_v36  ;;  %vm530_vm6 = vcmp.eq.f32.partialorder %v529_v38, 8.507059e+37 }
 0x21d   : > { %v698_v33 = vpop.eup %697 }
 0x21e   : > { %v521_v34 = vmul.f32 %v698_v33, %v496_v32  ;;  %vm526_vm3 = vweird.f32 %v698_v33 }
 0x21f   : > { %vm527_vm5 = vmor %vm525_vm4, %vm526_vm3 }
 0x220   : > { %v522_v35 = vsub.f32 1.0, %v521_v34 }
 0x222   : > { %v523_v37 = vmul.f32 %v698_v33, %v522_v35 }
 0x224   : > { %v524_v39 = vadd.f32 %v698_v33, %v523_v37 }
 0x225   : > { %v517_v42 = vpop.f32.mrf.mxu3 }
 0x226   : > { %v528_v41 = vsel %vm527_vm5, %v698_v33, %v524_v39 }
 0x227   : > { %v533_v43 = vsel %vm530_vm6, %v532_v40, %v528_v41 }
 0x228   : > { %v534_v44 = vmul.f32 %v533_v43, %v517_v42 }
 0x22a   : > { %535 = vst.msk [vmem:[%s349_s21] sm:$0xff] %vm460_vm1, %v534_v44 }
 0x22b   : > { %726 = shalt.err (!%p723_p3)
}
 0x22c   : > { %653 = dma.vmem_to_hbm [thread:$0]  (%p851_p5), %s550_s22, 128, %s552_s23, %s537_s13  }
 0x22d PF: > { %p659_p4 = scmp.ge.s32.totalorder %s761_s12, 2  ;;  %s563_s27 = sand.u32 1, %s749_s30  }
 0x22e   : > { %s564_s17 = scalar_lea.sflag [#allocation3], %s563_s27 }
 0x22f   : > { %p656_p7 = pnand %p659_p4, %p855_p6 }
 0x231   : > { %p657_p8 = pneg %p656_p7 }
 0x233   : > { %744 = dma.done.wait (%p657_p8), %s564_s17, 128  }
 0x234   : > { %746 = vsyncadd (%p657_p8), %s564_s17, 4294967168  ;;  %p19_p9 = scmp.ge.s32.totalorder %s838_s15, 4   ;;  %s967_s30 = smov %s753_s10 }
 0x235   : > { %s968_s10 = smov %s757_s11  ;;  %s969_s11 = smov %s849_s18 }
 0x236   : > { %s970_s12 = smov %s838_s15  ;;  %21 = sbr.rel (!%p19_p9) target bundleno = 3 (0x3), region = 97 }
 0x23b   :  { %570 = vsyncpa [#allocation3], 1 }
 0x23c   :  { %572 = vsyncpa [#allocation3 + $0x1], 1 }

</bundles_post_ra>
